<compile_context>
chip_gen: v7x
topology: tpu7x:2x2x1
jax: 0.10.0
libtpu: 0.0.40
codegen_flags: <defaults>
</compile_context>

<pallas_src>
import functools

import jax
import jax.numpy as jnp
from jax.experimental import pallas as pl
from jax.experimental.pallas import tpu as pltpu

# -----------------------------------------------------------------------------
# Problem sizes (small, deterministic)
# -----------------------------------------------------------------------------
N_NODES = 64        # total nodes across all graphs in the batch
F_IN = 32           # raw node feature dim
HIDDEN = 32         # hidden_dim of the Encoder
N_GRAPHS = 4        # number of graphs (global_add_pool groups)
N_EDGES = 128
DROPOUT_P = 0.2
BN_EPS = 1e-5
# keep element iff uniform uint32 bits >= DROP_THRESH  (P(keep) = 1 - p)
DROP_THRESH = int(DROPOUT_P * (1 << 32))
KEEP_SCALE = 1.0 / (1.0 - DROPOUT_P)

_VMEM = pl.BlockSpec(memory_space=pltpu.MemorySpace.VMEM)


# -----------------------------------------------------------------------------
# Single fused Pallas kernel: entire Encoder.forward
# -----------------------------------------------------------------------------
def _fused_forward_kernel(a_ref, x_ref, pool_ref,
                          w_enc_ref, b_enc_ref, alpha_enc_ref,
                          w_proj_ref, b_proj_ref,
                          w_pred_ref, b_pred_ref, alpha_pred_ref,
                          bits_ref,
                          g_ref, pred_ref):
    """Whole forward in one kernel (all operands resident in VMEM).

    Online and target encoder weights are lane-concatenated so each MXU matmul
    produces a 64-lane-wide [online || target] slab. The two augmented views
    are identical (identity augmentors), so the shared encoder / pool pass is
    computed once; only the two predictor dropout draws differ.

    TODO(synk): dropout bits come from host-side jax.random because
                pltpu.prng_seed/prng_random_bits have no CPU-interpret
                lowering; swap to the on-device PRNG when running TPU-only.
    """
    # GCN layer (both branches): h = PReLU(A_norm @ (x @ [W_on || W_tg]) + b)
    xw = jnp.dot(x_ref[...], w_enc_ref[...], preferred_element_type=jnp.float32)
    h = jnp.dot(a_ref[...], xw, preferred_element_type=jnp.float32) + b_enc_ref[...]
    h = jnp.where(h >= 0.0, h, alpha_enc_ref[...] * h)

    # global_add_pool for both branches in one MXU matmul: (G, N) @ (N, 2H)
    g_ref[...] = jnp.dot(pool_ref[...], h, preferred_element_type=jnp.float32)

    # projector: block-diagonal (2H, 2H) weight keeps branches independent
    h_proj = (jnp.dot(h, w_proj_ref[...], preferred_element_type=jnp.float32)
              + b_proj_ref[...])

    # predictor (online projection only, lanes [:HIDDEN]):
    #   Linear -> BatchNorm1d (training batch stats, gamma=1, beta=0) -> PReLU
    y = (jnp.dot(h_proj[:, :HIDDEN], w_pred_ref[...],
                 preferred_element_type=jnp.float32) + b_pred_ref[...])
    inv_n = 1.0 / y.shape[0]
    mean = jnp.sum(y, axis=0, keepdims=True) * inv_n
    var = jnp.sum(y * y, axis=0, keepdims=True) * inv_n - mean * mean
    y_hat = (y - mean) * jax.lax.rsqrt(var + BN_EPS)
    act = jnp.where(y_hat >= 0.0, y_hat, alpha_pred_ref[...] * y_hat)

    # Dropout: two independent draws (view 1 lanes [:H], view 2 lanes [H:]),
    # integer-threshold compare on raw uint32 bits, inverted scaling.
    keep = bits_ref[...] >= jnp.uint32(DROP_THRESH)
    act2 = jnp.concatenate([act, act], axis=1)
    pred_ref[...] = jnp.where(keep, act2 * KEEP_SCALE, 0.0)


def fused_forward(a_norm, x, pool, w_enc_cat, b_enc_cat, alpha_enc_cat,
                  w_proj_bd, b_proj_cat, w_pred, b_pred, alpha_pred, bits):
    n = x.shape[0]
    g_shape = jax.ShapeDtypeStruct((pool.shape[0], 2 * HIDDEN), jnp.float32)
    p_shape = jax.ShapeDtypeStruct((n, 2 * HIDDEN), jnp.float32)
    return pl.pallas_call(
        _fused_forward_kernel,
        out_shape=(g_shape, p_shape),
        in_specs=[_VMEM] * 12,
        out_specs=(_VMEM, _VMEM),
    )(a_norm, x, pool, w_enc_cat, b_enc_cat, alpha_enc_cat,
      w_proj_bd, b_proj_cat, w_pred, b_pred, alpha_pred, bits)


# -----------------------------------------------------------------------------
# Parameter construction (deterministic, PyTorch-style uniform init)
# -----------------------------------------------------------------------------
def _uniform(key, shape, fan_in):
    bound = 1.0 / jnp.sqrt(jnp.float32(fan_in))
    return jax.random.uniform(key, shape, jnp.float32, -bound, bound)


def init_params(key):
    ks = jax.random.split(key, 8)
    enc = {
        "w_enc": _uniform(ks[0], (F_IN, HIDDEN), F_IN),
        "b_enc": _uniform(ks[1], (HIDDEN,), F_IN),
        "alpha_enc": jnp.array([0.25], jnp.float32),      # PReLU default
        "w_proj": _uniform(ks[2], (HIDDEN, HIDDEN), HIDDEN),
        "b_proj": _uniform(ks[3], (HIDDEN,), HIDDEN),
    }
    pred = {
        "w": _uniform(ks[4], (HIDDEN, HIDDEN), HIDDEN),
        "b": _uniform(ks[5], (HIDDEN,), HIDDEN),
        "alpha": jnp.array([0.25], jnp.float32),           # PReLU default
    }
    return enc, pred


def build_norm_adjacency(edge_index, n_nodes):
    """Dense symmetric-normalized adjacency: D^-1/2 (A + I) D^-1/2.
    Only missing self-loops are added (matches PyG add_remaining_self_loops)."""
    src, dst = edge_index[0], edge_index[1]
    a = jnp.zeros((n_nodes, n_nodes), jnp.float32)
    a = a.at[src, dst].set(1.0)
    a = jnp.maximum(a, a.T)                                   # undirected
    a = jnp.maximum(a, jnp.eye(n_nodes, dtype=jnp.float32))   # self-loops capped at 1
    deg = jnp.sum(a, axis=1)
    d_inv_sqrt = jax.lax.rsqrt(jnp.maximum(deg, 1.0))
    return a * d_inv_sqrt[:, None] * d_inv_sqrt[None, :]


# -----------------------------------------------------------------------------
# Encoder.forward
# -----------------------------------------------------------------------------
@functools.partial(jax.jit, static_argnames=("num_graphs",))
def bgrl_encoder_forward(online_params, target_params, pred_params,
                         x, a_norm, batch, num_graphs, rng_key):
    h = HIDDEN

    # Identity augmentors => x1 == x2: the shared encoder / pool pass is
    # computed once and reused for both views (bit-identical to running twice).
    # Online and target encoder weights are lane-concatenated so the fused
    # kernel handles both branches with 64-lane-wide matmul outputs.
    w_enc_cat = jnp.concatenate(
        [online_params["w_enc"], target_params["w_enc"]], axis=1)
    b_enc_cat = jnp.concatenate(
        [online_params["b_enc"], target_params["b_enc"]])[None, :]
    alpha_enc_cat = jnp.concatenate([
        jnp.broadcast_to(online_params["alpha_enc"], (h,)),
        jnp.broadcast_to(target_params["alpha_enc"], (h,)),
    ])[None, :]
    zeros = jnp.zeros((h, h), jnp.float32)
    w_proj_bd = jnp.block([[online_params["w_proj"], zeros],
                           [zeros, target_params["w_proj"]]])
    b_proj_cat = jnp.concatenate(
        [online_params["b_proj"], target_params["b_proj"]])[None, :]

    # global_add_pool one-hot matrix, built once.
    pool = (jnp.arange(num_graphs, dtype=jnp.int32)[:, None]
            == batch[None, :].astype(jnp.int32)).astype(jnp.float32)

    # Two dropout draws (one per view), generated outside the kernel.
    bits = jax.random.bits(rng_key, (x.shape[0], 2 * h), dtype=jnp.uint32)

    g_cat, pred_cat = fused_forward(
        a_norm, x, pool, w_enc_cat, b_enc_cat, alpha_enc_cat,
        w_proj_bd, b_proj_cat,
        pred_params["w"], pred_params["b"][None, :],
        jnp.broadcast_to(pred_params["alpha"].reshape(1, 1), (1, h)),
        bits)

    g1 = g_cat[:, :h]
    g2 = g1                                    # identity augmentors: h1 == h2
    g_target = jax.lax.stop_gradient(g_cat[:, h:])   # target encoder, no grads
    h1_pred = pred_cat[:, :h]
    h2_pred = pred_cat[:, h:]
    return g1, g2, h1_pred, h2_pred, g_target, g_target


# -----------------------------------------------------------------------------
# Main
# -----------------------------------------------------------------------------
if __name__ == "__main__":
    key = jax.random.PRNGKey(0)
    k_x, k_e, k_p, k_d = jax.random.split(key, 4)

    # Deterministic synthetic graph batch.
    x = jax.random.normal(k_x, (N_NODES, F_IN), jnp.float32)
    edge_index = jax.random.randint(k_e, (2, N_EDGES), 0, N_NODES, jnp.int32)
    # 4 graphs of 16 nodes each.
    batch = jnp.repeat(jnp.arange(N_GRAPHS, dtype=jnp.int32),
                       N_NODES // N_GRAPHS)
    a_norm = build_norm_adjacency(edge_index, N_NODES)

    online_params, pred_params = init_params(k_p)
    # get_target_encoder(): deepcopy of online encoder parameters.
    target_params = jax.tree_util.tree_map(lambda p: p.copy(), online_params)

    outs = bgrl_encoder_forward(online_params, target_params, pred_params,
                                x, a_norm, batch, N_GRAPHS, k_d)
    outs = jax.block_until_ready(outs)

    g1, g2, h1_pred, h2_pred, g1_t, g2_t = outs
    assert g1.shape == (N_GRAPHS, HIDDEN)
    assert g2.shape == (N_GRAPHS, HIDDEN)
    assert h1_pred.shape == (N_NODES, HIDDEN)
    assert h2_pred.shape == (N_NODES, HIDDEN)
    assert g1_t.shape == (N_GRAPHS, HIDDEN)
    assert g2_t.shape == (N_GRAPHS, HIDDEN)
    assert all(bool(jnp.all(jnp.isfinite(o))) for o in outs)

    print("KERNEL_OK")
</pallas_src>

<mosaic_0001>
module attributes {stable_mosaic.version = 11 : i64} {
  func.func @_fused_forward_kernel(%arg0: memref<64x64xf32, #tpu.memory_space<vmem>>, %arg1: memref<64x32xf32, #tpu.memory_space<vmem>>, %arg2: memref<4x64xf32, #tpu.memory_space<vmem>>, %arg3: memref<32x64xf32, #tpu.memory_space<vmem>>, %arg4: memref<1x64xf32, #tpu.memory_space<vmem>>, %arg5: memref<1x64xf32, #tpu.memory_space<vmem>>, %arg6: memref<64x64xf32, #tpu.memory_space<vmem>>, %arg7: memref<1x64xf32, #tpu.memory_space<vmem>>, %arg8: memref<32x32xf32, #tpu.memory_space<vmem>>, %arg9: memref<1x32xf32, #tpu.memory_space<vmem>>, %arg10: memref<1x32xf32, #tpu.memory_space<vmem>>, %arg11: memref<64x64xi32, #tpu.memory_space<vmem>>, %arg12: memref<4x64xf32, #tpu.memory_space<vmem>>, %arg13: memref<64x64xf32, #tpu.memory_space<vmem>>) attributes {dimension_semantics = [], scalar_prefetch = 0 : i64, scratch_operands = 0 : i64, tpu.core_type = #tpu.core_type<tc>} {
    %c0 = arith.constant 0 : index
    %c0_0 = arith.constant 0 : index
    %0 = vector.load %arg1[%c0, %c0_0] : memref<64x32xf32, #tpu.memory_space<vmem>>, vector<64x32xf32>
    %c0_1 = arith.constant 0 : index
    %c0_2 = arith.constant 0 : index
    %1 = vector.load %arg3[%c0_1, %c0_2] : memref<32x64xf32, #tpu.memory_space<vmem>>, vector<32x64xf32>
    %cst = arith.constant dense<0.000000e+00> : vector<64x64xf32>
    %2 = tpu.matmul %0, %1, %cst {dimension_numbers = #tpu.dot_dimension_numbers<[1], [0], [0], [1], [0, 0, 1, 1], [], []>} : vector<64x32xf32>, vector<32x64xf32>, vector<64x64xf32> -> vector<64x64xf32>
    %c0_3 = arith.constant 0 : index
    %c0_4 = arith.constant 0 : index
    %3 = vector.load %arg0[%c0_3, %c0_4] : memref<64x64xf32, #tpu.memory_space<vmem>>, vector<64x64xf32>
    %cst_5 = arith.constant dense<0.000000e+00> : vector<64x64xf32>
    %4 = tpu.matmul %3, %2, %cst_5 {dimension_numbers = #tpu.dot_dimension_numbers<[1], [0], [0], [1], [0, 0, 1, 1], [], []>} : vector<64x64xf32>, vector<64x64xf32>, vector<64x64xf32> -> vector<64x64xf32>
    %c0_6 = arith.constant 0 : index
    %c0_7 = arith.constant 0 : index
    %5 = vector.load %arg4[%c0_6, %c0_7] : memref<1x64xf32, #tpu.memory_space<vmem>>, vector<1x64xf32>
    %6 = vector.broadcast %5 : vector<1x64xf32> to vector<64x64xf32>
    %7 = arith.addf %4, %6 : vector<64x64xf32>
    %cst_8 = arith.constant 0.000000e+00 : f32
    %8 = vector.broadcast %cst_8 : f32 to vector<64x64xf32>
    %9 = arith.cmpf oge, %7, %8 : vector<64x64xf32>
    %c0_9 = arith.constant 0 : index
    %c0_10 = arith.constant 0 : index
    %10 = vector.load %arg5[%c0_9, %c0_10] : memref<1x64xf32, #tpu.memory_space<vmem>>, vector<1x64xf32>
    %11 = vector.broadcast %10 : vector<1x64xf32> to vector<64x64xf32>
    %12 = arith.mulf %11, %7 : vector<64x64xf32>
    %13 = arith.select %9, %7, %12 : vector<64x64xi1>, vector<64x64xf32>
    %c0_11 = arith.constant 0 : index
    %c0_12 = arith.constant 0 : index
    %14 = vector.load %arg2[%c0_11, %c0_12] : memref<4x64xf32, #tpu.memory_space<vmem>>, vector<4x64xf32>
    %cst_13 = arith.constant dense<0.000000e+00> : vector<4x64xf32>
    %15 = tpu.matmul %14, %13, %cst_13 {dimension_numbers = #tpu.dot_dimension_numbers<[1], [0], [0], [1], [0, 0, 1, 1], [], []>} : vector<4x64xf32>, vector<64x64xf32>, vector<4x64xf32> -> vector<4x64xf32>
    %c0_14 = arith.constant 0 : index
    %c0_15 = arith.constant 0 : index
    %16 = vector.load %arg12[%c0_14, %c0_15] : memref<4x64xf32, #tpu.memory_space<vmem>>, vector<4x64xf32>
    tpu.vector_store %arg12[%c0_14, %c0_15], %15 {strides = array<i32>} : memref<4x64xf32, #tpu.memory_space<vmem>>, vector<4x64xf32>,
    %c0_16 = arith.constant 0 : index
    %c0_17 = arith.constant 0 : index
    %17 = vector.load %arg6[%c0_16, %c0_17] : memref<64x64xf32, #tpu.memory_space<vmem>>, vector<64x64xf32>
    %cst_18 = arith.constant dense<0.000000e+00> : vector<64x64xf32>
    %18 = tpu.matmul %13, %17, %cst_18 {dimension_numbers = #tpu.dot_dimension_numbers<[1], [0], [0], [1], [0, 0, 1, 1], [], []>} : vector<64x64xf32>, vector<64x64xf32>, vector<64x64xf32> -> vector<64x64xf32>
    %c0_19 = arith.constant 0 : index
    %c0_20 = arith.constant 0 : index
    %19 = vector.load %arg7[%c0_19, %c0_20] : memref<1x64xf32, #tpu.memory_space<vmem>>, vector<1x64xf32>
    %20 = vector.broadcast %19 : vector<1x64xf32> to vector<64x64xf32>
    %21 = arith.addf %18, %20 : vector<64x64xf32>
    %22 = vector.extract_strided_slice %21 {offsets = [0, 0], sizes = [64, 32], strides = [1, 1]} : vector<64x64xf32> to vector<64x32xf32>
    %c0_21 = arith.constant 0 : index
    %c0_22 = arith.constant 0 : index
    %23 = vector.load %arg8[%c0_21, %c0_22] : memref<32x32xf32, #tpu.memory_space<vmem>>, vector<32x32xf32>
    %cst_23 = arith.constant dense<0.000000e+00> : vector<64x32xf32>
    %24 = tpu.matmul %22, %23, %cst_23 {dimension_numbers = #tpu.dot_dimension_numbers<[1], [0], [0], [1], [0, 0, 1, 1], [], []>} : vector<64x32xf32>, vector<32x32xf32>, vector<64x32xf32> -> vector<64x32xf32>
    %c0_24 = arith.constant 0 : index
    %c0_25 = arith.constant 0 : index
    %25 = vector.load %arg9[%c0_24, %c0_25] : memref<1x32xf32, #tpu.memory_space<vmem>>, vector<1x32xf32>
    %26 = vector.broadcast %25 : vector<1x32xf32> to vector<64x32xf32>
    %27 = arith.addf %24, %26 : vector<64x32xf32>
    %cst_26 = arith.constant dense<0.000000e+00> : vector<32xf32>
    %28 = vector.multi_reduction <add>, %27, %cst_26 [0] : vector<64x32xf32> to vector<32xf32>
    %29 = vector.shape_cast %28 : vector<32xf32> to vector<1x32xf32>
    %cst_27 = arith.constant 1.562500e-02 : f32
    %30 = vector.broadcast %cst_27 : f32 to vector<1x32xf32>
    %31 = arith.mulf %29, %30 : vector<1x32xf32>
    %32 = arith.mulf %27, %27 : vector<64x32xf32>
    %cst_28 = arith.constant dense<0.000000e+00> : vector<32xf32>
    %33 = vector.multi_reduction <add>, %32, %cst_28 [0] : vector<64x32xf32> to vector<32xf32>
    %34 = vector.shape_cast %33 : vector<32xf32> to vector<1x32xf32>
    %cst_29 = arith.constant 1.562500e-02 : f32
    %35 = vector.broadcast %cst_29 : f32 to vector<1x32xf32>
    %36 = arith.mulf %34, %35 : vector<1x32xf32>
    %37 = arith.mulf %31, %31 : vector<1x32xf32>
    %38 = arith.subf %36, %37 : vector<1x32xf32>
    %39 = vector.broadcast %31 : vector<1x32xf32> to vector<64x32xf32>
    %40 = arith.subf %27, %39 : vector<64x32xf32>
    %cst_30 = arith.constant 9.99999974E-6 : f32
    %41 = vector.broadcast %cst_30 : f32 to vector<1x32xf32>
    %42 = arith.addf %38, %41 : vector<1x32xf32>
    %43 = math.rsqrt %42 : vector<1x32xf32>
    %44 = vector.broadcast %43 : vector<1x32xf32> to vector<64x32xf32>
    %45 = arith.mulf %40, %44 : vector<64x32xf32>
    %cst_31 = arith.constant 0.000000e+00 : f32
    %46 = vector.broadcast %cst_31 : f32 to vector<64x32xf32>
    %47 = arith.cmpf oge, %45, %46 : vector<64x32xf32>
    %c0_32 = arith.constant 0 : index
    %c0_33 = arith.constant 0 : index
    %48 = vector.load %arg10[%c0_32, %c0_33] : memref<1x32xf32, #tpu.memory_space<vmem>>, vector<1x32xf32>
    %49 = vector.broadcast %48 : vector<1x32xf32> to vector<64x32xf32>
    %50 = arith.mulf %49, %45 : vector<64x32xf32>
    %51 = arith.select %47, %45, %50 : vector<64x32xi1>, vector<64x32xf32>
    %c0_34 = arith.constant 0 : index
    %c0_35 = arith.constant 0 : index
    %52 = vector.load %arg11[%c0_34, %c0_35] : memref<64x64xi32, #tpu.memory_space<vmem>>, vector<64x64xi32>
    %c858993459_i32 = arith.constant 858993459 : i32
    %53 = vector.broadcast %c858993459_i32 : i32 to vector<64x64xi32>
    %54 = arith.cmpi uge, %52, %53 : vector<64x64xi32>
    %55 = tpu.concatenate %51, %51 in 1 : vector<64x32xf32>, vector<64x32xf32> -> vector<64x64xf32>
    %cst_36 = arith.constant 1.250000e+00 : f32
    %56 = vector.broadcast %cst_36 : f32 to vector<64x64xf32>
    %57 = arith.mulf %55, %56 : vector<64x64xf32>
    %cst_37 = arith.constant 0.000000e+00 : f32
    %58 = vector.broadcast %cst_37 : f32 to vector<64x64xf32>
    %59 = arith.select %54, %57, %58 : vector<64x64xi1>, vector<64x64xf32>
    %c0_38 = arith.constant 0 : index
    %c0_39 = arith.constant 0 : index
    %60 = vector.load %arg13[%c0_38, %c0_39] : memref<64x64xf32, #tpu.memory_space<vmem>>, vector<64x64xf32>
    tpu.vector_store %arg13[%c0_38, %c0_39], %59 {strides = array<i32>} : memref<64x64xf32, #tpu.memory_space<vmem>>, vector<64x64xf32>,
    return
  }
}

</mosaic_0001>

<bundles_post_ra>
// kernel: bgrl_encoder_forward.1
= control target key start
LH: loop header
LB: loop body
LE: loop exit
PB: predicated region body
PF: predicated region fallthrough
CT: control target
= control target key end

     0   :  { %vm55_vm0 = vcmask 261120   ;;  %vm200_vm1 = vcmask 523264   ;;  %v1196_v46 = vmov 0.0|0.0   ;;  %vm1197_vm2 = vmmov 0   ;;  %s1199_s20 = smov 32   ;;  %s1540_s3 = inlined_call_operand.vmem [shape: f32[32,64], index: 3, kind: input, shape index: {}]   ;;  %s1541_s1 = inlined_call_operand.vmem [shape: f32[64,32], index: 1, kind: input, shape index: {}]   ;;  %s1542_s0 = inlined_call_operand.vmem [shape: f32[64,64], index: 0, kind: input, shape index: {}]   ;;  %s1543_s6 = inlined_call_operand.vmem [shape: f32[64,64], index: 6, kind: input, shape index: {}]   ;;  %s1544_s4 = inlined_call_operand.vmem [shape: f32[1,64], index: 4, kind: input, shape index: {}]   ;;  %s1545_s5 = inlined_call_operand.vmem [shape: f32[1,64], index: 5, kind: input, shape index: {}]   ;;  %s1546_s8 = inlined_call_operand.vmem [shape: f32[32,32], index: 8, kind: input, shape index: {}]   ;;  %s1547_s2 = inlined_call_operand.vmem [shape: f32[4,64], index: 2, kind: input, shape index: {}]   ;;  %s1548_s7 = inlined_call_operand.vmem [shape: f32[1,64], index: 7, kind: input, shape index: {}]   ;;  %s1549_s12 = inlined_call_operand.vmem [shape: f32[4,64], index: 12, kind: output, shape index: {0}]   ;;  %s1550_s9 = inlined_call_operand.vmem [shape: f32[1,32], index: 9, kind: input, shape index: {}]   ;;  %s1551_s10 = inlined_call_operand.vmem [shape: f32[1,32], index: 10, kind: input, shape index: {}]   ;;  %s1552_s11 = inlined_call_operand.vmem [shape: u32[64,64], index: 11, kind: input, shape index: {}]   ;;  %s1553_s13 = inlined_call_operand.vmem [shape: f32[64,64], index: 13, kind: output, shape index: {1}]  }
   0x1   :  { %v51_v0 = vld [vmem:[%s1540_s3] sm:$0xff]  ;;  %v52_v1 = vld [vmem:[%s1540_s3 + $0x8] sm:$0xff]  ;;  %v53_v2 = vld [vmem:[%s1540_s3 + $0x10] sm:$0xff]  ;;  %v1198_v47 = vmov 0.0   ;;  %vm435_vm11 = vcmask 519168  }
   0x2   :  { %v1130_v3 = vpack.c.bf16 %v52_v1, %v51_v0  ;;  %v54_v4 = vld [vmem:[%s1540_s3 + $0x18] sm:$0xff]  ;;  %v43_v5 = vld [vmem:[%s1541_s1] sm:$0xff]  ;;  %v44_v7 = vld [vmem:[%s1541_s1 + $0x8] sm:$0xff] }
   0x3   :  { %v1134_v6 = vpack.c.bf16 %v54_v4, %v53_v2  ;;  %1023 = vmatprep.mubr.msk.f32.mxu0 %vm55_vm0, %v43_v5  ;;  %v45_v8 = vld [vmem:[%s1541_s1 + $0x10] sm:$0xff]  ;;  %v46_v9 = vld [vmem:[%s1541_s1 + $0x18] sm:$0xff]  ;;  %v47_v10 = vld [vmem:[%s1541_s1 + $0x20] sm:$0xff] }
   0x4   :  { %1131 = vmatprep.subr.bf16.mxu0 %v1130_v3  ;;  %v48_v11 = vld [vmem:[%s1541_s1 + $0x28] sm:$0xff]  ;;  %v49_v12 = vld [vmem:[%s1541_s1 + $0x30] sm:$0xff]  ;;  %v50_v13 = vld [vmem:[%s1541_s1 + $0x38] sm:$0xff] }
   0x5   :  { %1133 = vmatpush3.bf16.msra.mxu0 %v1130_v3  ;;  %v185_v14 = vld [vmem:[%s1542_s0] sm:$0xff]  ;;  %v438_v25 = vld [vmem:[%s1543_s6 + $0x8] sm:$0xff]  ;;  %v439_v30 = vld [vmem:[%s1543_s6 + $0x10] sm:$0xff] }
   0x6   :  { %1135 = vmatprep.subr.bf16.mxu0 %v1134_v6  ;;  %1051 = vmatprep.mubr.msk.f32.mxu1 %vm200_vm1, %v185_v14  ;;  %v437_v24 = vld [vmem:[%s1543_s6] sm:$0xff]  ;;  %v440_v31 = vld [vmem:[%s1543_s6 + $0x18] sm:$0xff]  ;;  %v186_v32 = vld [vmem:[%s1542_s0 + $0x8] sm:$0xff] }
   0x7   :  { %v1166_v29 = vpack.c.bf16 %v438_v25, %v437_v24  ;;  %v187_v33 = vld [vmem:[%s1542_s0 + $0x10] sm:$0xff]  ;;  %v1170_v34 = vpack.c.bf16 %v440_v31, %v439_v30  ;;  %v441_v35 = vld [vmem:[%s1543_s6 + $0x20] sm:$0xff]  ;;  %v442_v36 = vld [vmem:[%s1543_s6 + $0x28] sm:$0xff] }
   0x8   :  { %v188_v37 = vld [vmem:[%s1542_s0 + $0x18] sm:$0xff]  ;;  %v189_v38 = vld [vmem:[%s1542_s0 + $0x20] sm:$0xff]  ;;  %v1174_v39 = vpack.c.bf16 %v442_v36, %v441_v35  ;;  %v190_v40 = vld [vmem:[%s1542_s0 + $0x28] sm:$0xff] }
   0x9   :  { %1137 = vmatpush3.bf16.msra.mxu0 %v1134_v6  ;;  %v191_v41 = vld [vmem:[%s1542_s0 + $0x30] sm:$0xff]  ;;  %v192_v42 = vld [vmem:[%s1542_s0 + $0x38] sm:$0xff]  ;;  %v920_v48 = vld [vmem:[%s1544_s4] ss:$0 sm:$0xff] }
   0xa   :  { %v443_v43 = vld [vmem:[%s1543_s6 + $0x30] sm:$0xff]  ;;  %v444_v44 = vld [vmem:[%s1543_s6 + $0x38] sm:$0xff]  ;;  %1154 = vmatprep.subr.bf16.mxu0 %v1196_v46  ;;  %v929_v50 = vld [vmem:[%s1545_s5] ss:$0 sm:$0xff] }
   0xb   :  { %v1178_v45 = vpack.c.bf16 %v444_v44, %v443_v43  ;;  %v361_v25 = vld [vmem:[%s1547_s2] sm:$0xf] }
   0xc   :  { %1024 = vmatmul.mubr.msk.f32.vlgmr.msra.gmra.mrb[0].mxu0 %vm55_vm0, %v44_v7 }
   0xd   :  { %1026 = vmatprep.mubr.msk.f32.mxu0 %vm55_vm0, %v45_v8 }
  0x10   :  { %1027 = vmatmul.mubr.msk.f32.gmra.mrb[2].mxu0 %vm55_vm0, %v46_v9 }
  0x11   :  { %1029 = vmatprep.mubr.msk.f32.mxu0 %vm55_vm0, %v47_v10 }
  0x14   :  { %1030 = vmatmul.mubr.msk.f32.gmra.mrb[4].mxu0 %vm55_vm0, %v48_v11 }
  0x15   :  { %1032 = vmatprep.mubr.msk.f32.mxu0 %vm55_vm0, %v49_v12 }
  0x18   :  { %1033 = vmatmul.mubr.msk.f32.gmra.mrb[6].mxu0 %vm55_vm0, %v50_v13 }
  0x19   :  { %1079 = vmatprep.mubr.msk.f32.mxu0 %vm1197_vm2, %v1198_v47 }
  0xdf   :  { %v1025_v15 = vpop.f32.mrb[0].mxu0 }
  0xe0   :  { %v146_v16 = vpop.f32.mrb[1].mxu0 }
  0xe1   :  { %v1138_v17 = vpack.c.bf16 %v1025_v15, %v146_v16 }
  0xe3   :  { %v1028_v18 = vpop.f32.mrb[2].mxu0  ;;  %1139 = vmatprep.subr.bf16.mxu1 %v1138_v17 }
  0xe4   :  { %v156_v19 = vpop.f32.mrb[3].mxu0  ;;  %1141 = vmatpush3.bf16.msra.mxu1 %v1138_v17 }
  0xe5   :  { %v1142_v20 = vpack.c.bf16 %v1028_v18, %v156_v19  ;;  %v581_v18 = vld [vmem:[%s1546_s8] sm:$0xff]  ;;  %v582_v19 = vld [vmem:[%s1546_s8 + $0x8] sm:$0xff] }
  0xe7   :  { %v1031_v21 = vpop.f32.mrb[4].mxu0  ;;  %1143 = vmatprep.subr.bf16.mxu1 %v1142_v20 }
  0xe8   :  { %v166_v22 = vpop.f32.mrb[5].mxu0  ;;  %1145 = vmatpush3.bf16.msra.mxu1 %v1142_v20 }
  0xe9   :  { %v1146_v23 = vpack.c.bf16 %v1031_v21, %v166_v22 }
  0xeb   :  { %v1034_v26 = vpop.f32.mrb[6].mxu0  ;;  %1147 = vmatprep.subr.bf16.mxu1 %v1146_v23 }
  0xec   :  { %v176_v27 = vpop.f32.mrb[7].mxu0  ;;  %1149 = vmatpush3.bf16.msra.mxu1 %v1146_v23  ;;  %v1182_v23 = vpack.c.bf16 %v582_v19, %v581_v18 }
  0xed   :  { %v1150_v28 = vpack.c.bf16 %v1034_v26, %v176_v27  ;;  %v583_v26 = vld [vmem:[%s1546_s8 + $0x10] sm:$0xff]  ;;  %v584_v27 = vld [vmem:[%s1546_s8 + $0x18] sm:$0xff] }
  0xef   :  { %1151 = vmatprep.subr.bf16.mxu1 %v1150_v28 }
  0xf0   :  { %1153 = vmatpush3.bf16.msra.mxu1 %v1150_v28  ;;  %v1186_v28 = vpack.c.bf16 %v584_v27, %v583_v26 }
  0xf1   :  { %1167 = vmatprep.subr.bf16.mxu1 %v1166_v29 }
  0xf3   :  { %1052 = vmatmul.mubr.msk.f32.vlgmr.msra.gmra.mrb[0].mxu1 %vm200_vm1, %v186_v32 }
  0xf4   :  { %1054 = vmatprep.mubr.msk.f32.mxu1 %vm200_vm1, %v187_v33  ;;  %1169 = vmatpush3.bf16.msra.mxu1 %v1166_v29  ;;  %v931_v29 = vld [vmem:[%s1548_s7] ss:$0 sm:$0xff] }
  0xf5   :  { %1171 = vmatprep.subr.bf16.mxu1 %v1170_v34 }
  0xf7   :  { %1055 = vmatmul.mubr.msk.f32.gmra.mrb[2].mxu1 %vm200_vm1, %v188_v37 }
  0xf8   :  { %1057 = vmatprep.mubr.msk.f32.mxu1 %vm200_vm1, %v189_v38  ;;  %1173 = vmatpush3.bf16.msra.mxu1 %v1170_v34 }
  0xf9   :  { %1175 = vmatprep.subr.bf16.mxu1 %v1174_v39 }
  0xfb   :  { %1058 = vmatmul.mubr.msk.f32.gmra.mrb[4].mxu1 %vm200_vm1, %v190_v40 }
  0xfc   :  { %1060 = vmatprep.mubr.msk.f32.mxu1 %vm200_vm1, %v191_v41  ;;  %1177 = vmatpush3.bf16.msra.mxu1 %v1174_v39 }
  0xfd   :  { %1179 = vmatprep.subr.bf16.mxu1 %v1178_v45 }
  0xff   :  { %1061 = vmatmul.mubr.msk.f32.gmra.mrb[6].mxu1 %vm200_vm1, %v192_v42 }
 0x100   :  { %1181 = vmatpush3.bf16.msra.mxu1 %v1178_v45 }
 0x1c6   :  { %v1053_v49 = vpop.f32.mrb[0].mxu1 }
 0x1c7   :  { %v297_v51 = vadd.f32 %v1053_v49, %v920_v48  ;;  %v291_v52 = vpop.f32.mrb[1].mxu1 }
 0x1c8   :  { %v292_v53 = vadd.f32 %v920_v48, %v291_v52 }
 0x1c9   :  { %vm331_vm3 = vcmp.ge.f32.partialorder %v297_v51, 0.0  ;;  %v346_v54 = vmul.f32 %v929_v50, %v297_v51 }
 0x1ca   :  { %vm330_vm4 = vcmp.ge.f32.partialorder %v292_v53, 0.0  ;;  %v345_v55 = vmul.f32 %v929_v50, %v292_v53  ;;  %v1056_v56 = vpop.f32.mrb[2].mxu1 }
 0x1cb   :  { %v354_v57 = vsel %vm331_vm3, %v297_v51, %v346_v54  ;;  %v307_v58 = vadd.f32 %v1056_v56, %v920_v48  ;;  %v301_v59 = vpop.f32.mrb[3].mxu1 }
 0x1cc   :  { %v302_v60 = vadd.f32 %v920_v48, %v301_v59  ;;  %v353_v61 = vsel %vm330_vm4, %v292_v53, %v345_v55 }
 0x1cd   :  { %vm333_vm5 = vcmp.ge.f32.partialorder %v307_v58, 0.0  ;;  %v348_v62 = vmul.f32 %v929_v50, %v307_v58  ;;  %v1155_v63 = vpack.c.bf16 %v354_v57, %v353_v61  ;;  %1098 = vmatprep.mubr.msk.f32.mxu1 %vm200_vm1, %v353_v61 }
 0x1ce   :  { %vm332_vm6 = vcmp.ge.f32.partialorder %v302_v60, 0.0  ;;  %v347_v0 = vmul.f32 %v929_v50, %v302_v60  ;;  %v1059_v1 = vpop.f32.mrb[4].mxu1  ;;  %1099 = vmatmul.mubr.msk.f32.vlgmr.msra.gmra.mrb[8].mxu1 %vm200_vm1, %v354_v57 }
 0x1cf   :  { %v317_v2 = vadd.f32 %v1059_v1, %v920_v48  ;;  %v311_v3 = vpop.f32.mrb[5].mxu1  ;;  %1156 = vmatpush3.bf16.msra.mxu0 %v1155_v63  ;;  %v356_v4 = vsel %vm333_vm5, %v307_v58, %v348_v62 }
 0x1d0   :  { %v312_v5 = vadd.f32 %v920_v48, %v311_v3  ;;  %v355_v6 = vsel %vm332_vm6, %v302_v60, %v347_v0  ;;  %1157 = vmatprep.subr.bf16.mxu0 %v1196_v46 }
 0x1d1   :  { %vm335_vm7 = vcmp.ge.f32.partialorder %v317_v2, 0.0  ;;  %v350_v7 = vmul.f32 %v929_v50, %v317_v2  ;;  %1101 = vmatprep.mubr.msk.f32.mxu1 %vm200_vm1, %v355_v6  ;;  %v1158_v8 = vpack.c.bf16 %v356_v4, %v355_v6 }
 0x1d2   :  { %vm334_vm8 = vcmp.ge.f32.partialorder %v312_v5, 0.0  ;;  %v349_v9 = vmul.f32 %v929_v50, %v312_v5  ;;  %v1062_v10 = vpop.f32.mrb[6].mxu1  ;;  %1102 = vmatmul.mubr.msk.f32.gmra.mrb[10].mxu1 %vm200_vm1, %v356_v4 }
 0x1d3   :  { %v327_v11 = vadd.f32 %v1062_v10, %v920_v48  ;;  %v321_v12 = vpop.f32.mrb[7].mxu1  ;;  %1159 = vmatpush3.bf16.msra.mxu0 %v1158_v8  ;;  %v358_v13 = vsel %vm335_vm7, %v317_v2, %v350_v7 }
 0x1d4   :  { %v322_v14 = vadd.f32 %v920_v48, %v321_v12  ;;  %v357_v15 = vsel %vm334_vm8, %v312_v5, %v349_v9  ;;  %1160 = vmatprep.subr.bf16.mxu0 %v1196_v46  ;;  %v940_v48 = vld [vmem:[%s1550_s9] ss:$0 sm:$0xff] }
 0x1d5   :  { %vm337_vm9 = vcmp.ge.f32.partialorder %v327_v11, 0.0  ;;  %v352_v16 = vmul.f32 %v929_v50, %v327_v11  ;;  %1104 = vmatprep.mubr.msk.f32.mxu1 %vm200_vm1, %v357_v15  ;;  %v1161_v17 = vpack.c.bf16 %v358_v13, %v357_v15 }
 0x1d6   :  { %vm336_vm10 = vcmp.ge.f32.partialorder %v322_v14, 0.0  ;;  %v351_v20 = vmul.f32 %v929_v50, %v322_v14  ;;  %1105 = vmatmul.mubr.msk.f32.gmra.mrb[12].mxu1 %vm200_vm1, %v358_v13 }
 0x1d7   :  { %1162 = vmatpush3.bf16.msra.mxu0 %v1161_v17  ;;  %v360_v21 = vsel %vm337_vm9, %v327_v11, %v352_v16 }
 0x1d8   :  { %v359_v22 = vsel %vm336_vm10, %v322_v14, %v351_v20  ;;  %1163 = vmatprep.subr.bf16.mxu0 %v1196_v46 }
 0x1d9   :  { %1107 = vmatprep.mubr.msk.f32.mxu1 %vm200_vm1, %v359_v22  ;;  %v1164_v24 = vpack.c.bf16 %v360_v21, %v359_v22 }
 0x1da   :  { %1108 = vmatmul.mubr.msk.f32.gmra.mrb[14].mxu1 %vm200_vm1, %v360_v21 }
 0x1db   :  { %1165 = vmatpush3.bf16.msra.mxu0 %v1164_v24 }
 0x1dc   :  { %1183 = vmatprep.subr.bf16.mxu0 %v1182_v23 }
 0x1de   :  { %1080 = vmatmul.mubr.msk.f32.vlgmr.msra.gmra.mrb[8].mxu0 %vm200_vm1, %v361_v25 }
 0x1df   :  { %1185 = vmatpush3.bf16.msra.mxu0 %v1182_v23 }
 0x1e0   :  { %1187 = vmatprep.subr.bf16.mxu0 %v1186_v28 }
 0x1e3   :  { %1189 = vmatpush3.bf16.msra.mxu0 %v1186_v28 }
 0x2a1   :  { %v1100_v30 = vpop.f32.mrb[8].mxu1 }
 0x2a2   :  { %v542_v31 = vpop.f32.mrb[9].mxu1  ;;  %v548_v33 = vadd.f32 %v1100_v30, %v931_v29 }
 0x2a3   :  { %v543_v32 = vadd.f32 %v931_v29, %v542_v31 }
 0x2a5   :  { %v1103_v34 = vpop.f32.mrb[10].mxu1  ;;  %1118 = vmatprep.mubr.msk.f32.mxu0 %vm55_vm0, %v543_v32 }
 0x2a6   :  { %v552_v35 = vpop.f32.mrb[11].mxu1  ;;  %1119 = vmatmul.mubr.msk.f32.vlgmr.msra.gmra.mrb[10].mxu0 %vm55_vm0, %v548_v33  ;;  %v558_v37 = vadd.f32 %v1103_v34, %v931_v29 }
 0x2a7   :  { %v553_v36 = vadd.f32 %v931_v29, %v552_v35 }
 0x2a9   :  { %v1106_v38 = vpop.f32.mrb[12].mxu1  ;;  %1121 = vmatprep.mubr.msk.f32.mxu0 %vm55_vm0, %v553_v36 }
 0x2aa   :  { %v562_v39 = vpop.f32.mrb[13].mxu1  ;;  %1122 = vmatmul.mubr.msk.f32.gmra.mrb[12].mxu0 %vm55_vm0, %v558_v37  ;;  %v568_v41 = vadd.f32 %v1106_v38, %v931_v29 }
 0x2ab   :  { %v563_v40 = vadd.f32 %v931_v29, %v562_v39 }
 0x2ad   :  { %v1109_v42 = vpop.f32.mrb[14].mxu1  ;;  %1124 = vmatprep.mubr.msk.f32.mxu0 %vm55_vm0, %v563_v40 }
 0x2ae   :  { %v572_v43 = vpop.f32.mrb[15].mxu1  ;;  %1125 = vmatmul.mubr.msk.f32.gmra.mrb[14].mxu0 %vm55_vm0, %v568_v41  ;;  %v578_v45 = vadd.f32 %v1109_v42, %v931_v29 }
 0x2af   :  { %v573_v44 = vadd.f32 %v931_v29, %v572_v43 }
 0x2b1   :  { %1127 = vmatprep.mubr.msk.f32.mxu0 %vm55_vm0, %v573_v44  ;;  %v431_v46 = vpop.f32.mrb[8].mxu0 }
 0x2b2   :  { %1128 = vmatmul.mubr.msk.f32.gmra.mrb[16].mxu0 %vm55_vm0, %v578_v45  ;;  %436 = vst.msk [vmem:[%s1549_s12] sm:$0xf] %vm435_vm11, %v431_v46  ;;  %v1081_v47 = vpop.f32.mrb[9].mxu0 }
 0x379   :  { %v1120_v49 = vpop.f32.mrb[10].mxu0 }
 0x37a   :  { %v1421_v50 = vadd.f32 %v1120_v49, %v940_v48  ;;  %v682_v51 = vpop.f32.mrb[11].mxu0 }
 0x37b   :  { %v1423_v52 = vadd.f32 %v940_v48, %v682_v51 }
 0x37c   :  { %v722_v53 = vsel %vm55_vm0, %v1421_v50, 0.0  ;;  %v744_v54 = vmul.f32 %v1421_v50, %v1421_v50 }
 0x37d   :  { %v721_v55 = vsel %vm55_vm0, %v1423_v52, 0.0  ;;  %v743_v56 = vmul.f32 %v1423_v52, %v1423_v52  ;;  %v1123_v57 = vpop.f32.mrb[12].mxu0 }
 0x37e   :  { %v752_v58 = vsel %vm55_vm0, %v744_v54, 0.0  ;;  %v723_v59 = vadd.f32 %v722_v53, %v721_v55  ;;  %v1434_v60 = vadd.f32 %v1123_v57, %v940_v48  ;;  %v692_v61 = vpop.f32.mrb[13].mxu0 }
 0x37f   :  { %v751_v62 = vsel %vm55_vm0, %v743_v56, 0.0  ;;  %v1437_v63 = vadd.f32 %v940_v48, %v692_v61 }
 0x380   :  { %v753_v0 = vadd.f32 %v752_v58, %v751_v62  ;;  %v746_v1 = vmul.f32 %v1434_v60, %v1434_v60  ;;  %v726_v8 = vsel %vm55_vm0, %v1434_v60, 0.0 }
 0x381   :  { %v724_v2 = vsel %vm55_vm0, %v1437_v63, 0.0  ;;  %v745_v3 = vmul.f32 %v1437_v63, %v1437_v63  ;;  %v1126_v4 = vpop.f32.mrb[14].mxu0 }
 0x382   :  { %v725_v5 = vadd.f32 %v724_v2, %v723_v59  ;;  %v1445_v6 = vadd.f32 %v1126_v4, %v940_v48  ;;  %v702_v7 = vpop.f32.mrb[15].mxu0  ;;  %v756_v13 = vsel %vm55_vm0, %v746_v1, 0.0 }
 0x383   :  { %v754_v9 = vsel %vm55_vm0, %v745_v3, 0.0  ;;  %v1450_v10 = vadd.f32 %v940_v48, %v702_v7 }
 0x384   :  { %v755_v11 = vadd.f32 %v754_v9, %v753_v0  ;;  %v727_v12 = vadd.f32 %v726_v8, %v725_v5  ;;  %v748_v14 = vmul.f32 %v1445_v6, %v1445_v6  ;;  %v730_v22 = vsel %vm55_vm0, %v1445_v6, 0.0  ;;  %v949_v5 = vld [vmem:[%s1551_s10] ss:$0 sm:$0xff] }
 0x385   :  { %v728_v15 = vsel %vm55_vm0, %v1450_v10, 0.0  ;;  %v747_v16 = vmul.f32 %v1450_v10, %v1450_v10  ;;  %v1129_v17 = vpop.f32.mrb[16].mxu0 }
 0x386   :  { %v729_v18 = vadd.f32 %v728_v15, %v727_v12  ;;  %v757_v19 = vadd.f32 %v756_v13, %v755_v11  ;;  %v718_v20 = vadd.f32 %v1129_v17, %v940_v48  ;;  %v712_v21 = vpop.f32.mrb[17].mxu0  ;;  %v760_v27 = vsel %vm55_vm0, %v748_v14, 0.0 }
 0x387   :  { %v758_v23 = vsel %vm55_vm0, %v747_v16, 0.0  ;;  %v713_v24 = vadd.f32 %v940_v48, %v712_v21 }
 0x388   :  { %v759_v25 = vadd.f32 %v758_v23, %v757_v19  ;;  %v731_v26 = vadd.f32 %v730_v22, %v729_v18  ;;  %v750_v28 = vmul.f32 %v718_v20, %v718_v20  ;;  %v734_v33 = vsel %vm55_vm0, %v718_v20, 0.0 }
 0x389   :  { %v732_v29 = vsel %vm55_vm0, %v713_v24, 0.0  ;;  %v749_v30 = vmul.f32 %v713_v24, %v713_v24 }
 0x38a   :  { %v733_v31 = vadd.f32 %v732_v29, %v731_v26  ;;  %v761_v32 = vadd.f32 %v760_v27, %v759_v25  ;;  %v764_v37 = vsel %vm55_vm0, %v750_v28, 0.0  ;;  %v826_v26 = vld [vmem:[%s1552_s11 + $0x10] sm:$0xff]  ;;  %v824_v27 = vld [vmem:[%s1552_s11] sm:$0xff] }
 0x38b   :  { %v762_v34 = vsel %vm55_vm0, %v749_v30, 0.0  ;;  %vm834_vm6 = vcmp.ge.u32.totalorder %v826_v26, 858993459  ;;  %vm832_vm7 = vcmp.ge.u32.totalorder %v824_v27, 858993459 }
 0x38c   :  { %v735_v35 = vadd.f32 %v734_v33, %v733_v31  ;;  %v763_v36 = vadd.f32 %v762_v34, %v761_v32  ;;  %v827_v34 = vld [vmem:[%s1552_s11 + $0x18] sm:$0xff] }
 0x38d   :  { %vm835_vm8 = vcmp.ge.u32.totalorder %v827_v34, 858993459 }
 0x38e   :  { %v736_v38 = vrot.slane %v735_v35, 4  ;;  %v765_v39 = vadd.f32 %v764_v37, %v763_v36 }
 0x390   :  { %v737_v40 = vadd.f32 %v736_v38, %v735_v35  ;;  %v766_v41 = vrot.slane %v765_v39, 4  ;;  %v825_v35 = vld [vmem:[%s1552_s11 + $0x8] sm:$0xff] }
 0x391   :  { %vm833_vm9 = vcmp.ge.u32.totalorder %v825_v35, 858993459 }
 0x392   :  { %v738_v42 = vrot.slane %v737_v40, 2  ;;  %v767_v43 = vadd.f32 %v766_v41, %v765_v39 }
 0x394   :  { %v739_v44 = vadd.f32 %v738_v42, %v737_v40  ;;  %v768_v45 = vrot.slane %v767_v43, 2 }
 0x396   :  { %v740_v46 = vrot.slane %v739_v44, 1  ;;  %v769_v47 = vadd.f32 %v768_v45, %v767_v43  ;;  %v828_v45 = vld [vmem:[%s1552_s11 + $0x20] sm:$0xff] }
 0x397   :  { %vm836_vm11 = vcmp.ge.u32.totalorder %v828_v45, 858993459 }
 0x398   :  { %v741_v48 = vadd.f32 %v740_v46, %v739_v44  ;;  %v770_v49 = vrot.slane %v769_v47, 1  ;;  %v829_v44 = vld [vmem:[%s1552_s11 + $0x28] sm:$0xff] }
 0x399   :  { %vm837_vm10 = vcmp.ge.u32.totalorder %v829_v44, 858993459 }
 0x39a   :  { %v742_v51 = vmul.f32 0.015625, %v741_v48  ;;  %v771_v53 = vadd.f32 %v770_v49, %v769_v47 }
 0x39c   :  { %v772_v54 = vmul.f32 0.015625, %v771_v53  ;;  %v773_v55 = vmul.f32 %v742_v51, %v742_v51  ;;  %v781_v56 = vsub.f32 %v713_v24, %v742_v51  ;;  %v777_v57 = vsub.f32 %v1437_v63, %v742_v51 }
 0x39d   :  { %v775_v58 = vsub.f32 %v1423_v52, %v742_v51  ;;  %v778_v59 = vsub.f32 %v1434_v60, %v742_v51  ;;  %v776_v61 = vsub.f32 %v1421_v50, %v742_v51  ;;  %v780_v62 = vsub.f32 %v1445_v6, %v742_v51 }
 0x39e   :  { %v774_v0 = vsub.f32 %v772_v54, %v773_v55  ;;  %v779_v1 = vsub.f32 %v1450_v10, %v742_v51  ;;  %v782_v2 = vsub.f32 %v718_v20, %v742_v51 }
 0x3a0   :  { %v783_v3 = vadd.f32 1e-05, %v774_v0 }
 0x3a2   :  { %1194 = vrsqrt.f32 %v783_v3 }
 0x3ac   :  { %v1195_v4 = vpop.eup %1194 }
 0x3ad   :  { %v787_v63 = vmul.f32 %v1195_v4, %v777_v57  ;;  %v785_v7 = vmul.f32 %v1195_v4, %v775_v58  ;;  %v788_v52 = vmul.f32 %v1195_v4, %v778_v59  ;;  %v786_v8 = vmul.f32 %v1195_v4, %v776_v61  ;;  %v830_v57 = vld [vmem:[%s1552_s11 + $0x30] sm:$0xff] }
 0x3ae   :  { %v790_v60 = vmul.f32 %v1195_v4, %v780_v62  ;;  %v789_v9 = vmul.f32 %v1195_v4, %v779_v1  ;;  %v792_v50 = vmul.f32 %v1195_v4, %v782_v2  ;;  %v791_v11 = vmul.f32 %v1195_v4, %v781_v56  ;;  %v831_v56 = vld [vmem:[%s1552_s11 + $0x38] sm:$0xff] }
 0x3af   :  { %vm795_vm12 = vcmp.ge.f32.partialorder %v787_v63, 0.0  ;;  %v810_v6 = vmul.f32 %v949_v5, %v787_v63  ;;  %vm793_vm13 = vcmp.ge.f32.partialorder %v785_v7, 0.0  ;;  %v808_v10 = vmul.f32 %v949_v5, %v785_v7 }
 0x3b0   :  { %v811_v14 = vmul.f32 %v949_v5, %v788_v52  ;;  %v809_v15 = vmul.f32 %v949_v5, %v786_v8  ;;  %vm796_vm14 = vcmp.ge.f32.partialorder %v788_v52, 0.0  ;;  %vm794_vm15 = vcmp.ge.f32.partialorder %v786_v8, 0.0 }
 0x3b1   :  { %v818_v12 = vsel %vm795_vm12, %v787_v63, %v810_v6  ;;  %v816_v13 = vsel %vm793_vm13, %v785_v7, %v808_v10  ;;  %v813_v18 = vmul.f32 %v949_v5, %v790_v60  ;;  %v812_v19 = vmul.f32 %v949_v5, %v789_v9 }
 0x3b2   :  { %852 = vrot.lane.b32.xlu1 %v818_v12, %s1199_s20  ;;  %848 = vrot.lane.b32.xlu0 %v816_v13, %s1199_s20  ;;  %v819_v16 = vsel %vm796_vm14, %v788_v52, %v811_v14  ;;  %v817_v17 = vsel %vm794_vm15, %v786_v8, %v809_v15  ;;  %vm798_vm2 = vcmp.ge.f32.partialorder %v790_v60, 0.0  ;;  %vm797_vm3 = vcmp.ge.f32.partialorder %v789_v9, 0.0 }
 0x3b3   :  { %v821_v20 = vsel %vm798_vm2, %v790_v60, %v813_v18  ;;  %v820_v21 = vsel %vm797_vm3, %v789_v9, %v812_v19  ;;  %v815_v22 = vmul.f32 %v949_v5, %v792_v50  ;;  %v814_v23 = vmul.f32 %v949_v5, %v791_v11 }
 0x3b4   :  { %vm800_vm4 = vcmp.ge.f32.partialorder %v792_v50, 0.0  ;;  %vm799_vm5 = vcmp.ge.f32.partialorder %v791_v11, 0.0  ;;  %vm839_vm12 = vcmp.ge.u32.totalorder %v831_v56, 858993459  ;;  %vm838_vm13 = vcmp.ge.u32.totalorder %v830_v57, 858993459 }
 0x3b5   :  { %v823_v24 = vsel %vm800_vm4, %v792_v50, %v815_v22  ;;  %v822_v25 = vsel %vm799_vm5, %v791_v11, %v814_v23 }
 0x3b6   :  { %854 = vrot.lane.b32.xlu1 %v819_v16, %s1199_s20  ;;  %850 = vrot.lane.b32.xlu0 %v817_v17, %s1199_s20 }
 0x3ba   :  { %858 = vrot.lane.b32.xlu1 %v821_v20, %s1199_s20  ;;  %856 = vrot.lane.b32.xlu0 %v820_v21, %s1199_s20 }
 0x3be   :  { %862 = vrot.lane.b32.xlu1 %v823_v24, %s1199_s20  ;;  %860 = vrot.lane.b32.xlu0 %v822_v25, %s1199_s20 }
 0x424   :  { %v853_v28 = vpop.permute.xlu1 %852  ;;  %v849_v29 = vpop.permute.xlu0 %848 }
 0x425   :  { %v874_v30 = vsel %vm55_vm0, %v818_v12, %v853_v28  ;;  %v872_v31 = vsel %vm55_vm0, %v816_v13, %v849_v29 }
 0x426   :  { %v882_v32 = vmul.f32 1.25, %v874_v30  ;;  %v880_v33 = vmul.f32 1.25, %v872_v31 }
 0x428   :  { %v890_v36 = vsel %vm834_vm6, %v882_v32, 0.0  ;;  %v888_v37 = vsel %vm832_vm7, %v880_v33, 0.0  ;;  %v855_v38 = vpop.permute.xlu1 %854  ;;  %v851_v39 = vpop.permute.xlu0 %850 }
 0x429   :  { %898 = vst.msk [vmem:[%s1553_s13 + $0x10] sm:$0xff] %vm200_vm1, %v890_v36  ;;  %896 = vst.msk [vmem:[%s1553_s13] sm:$0xff] %vm200_vm1, %v888_v37  ;;  %v875_v40 = vsel %vm55_vm0, %v819_v16, %v855_v38  ;;  %v873_v41 = vsel %vm55_vm0, %v817_v17, %v851_v39 }
 0x42a   :  { %v883_v42 = vmul.f32 1.25, %v875_v40  ;;  %v881_v43 = vmul.f32 1.25, %v873_v41 }
 0x42c   :  { %v891_v46 = vsel %vm835_vm8, %v883_v42, 0.0  ;;  %v889_v47 = vsel %vm833_vm9, %v881_v43, 0.0  ;;  %v859_v48 = vpop.permute.xlu1 %858  ;;  %v857_v49 = vpop.permute.xlu0 %856 }
 0x42d   :  { %899 = vst.msk [vmem:[%s1553_s13 + $0x18] sm:$0xff] %vm200_vm1, %v891_v46  ;;  %897 = vst.msk [vmem:[%s1553_s13 + $0x8] sm:$0xff] %vm200_vm1, %v889_v47  ;;  %v877_v51 = vsel %vm55_vm0, %v821_v20, %v859_v48  ;;  %v876_v53 = vsel %vm55_vm0, %v820_v21, %v857_v49 }
 0x42e   :  { %v885_v54 = vmul.f32 1.25, %v877_v51  ;;  %v884_v55 = vmul.f32 1.25, %v876_v53 }
 0x430   :  { %v893_v58 = vsel %vm837_vm10, %v885_v54, 0.0  ;;  %v892_v59 = vsel %vm836_vm11, %v884_v55, 0.0  ;;  %v863_v61 = vpop.permute.xlu1 %862  ;;  %v861_v62 = vpop.permute.xlu0 %860 }
 0x431   :  { %901 = vst.msk [vmem:[%s1553_s13 + $0x28] sm:$0xff] %vm200_vm1, %v893_v58  ;;  %900 = vst.msk [vmem:[%s1553_s13 + $0x20] sm:$0xff] %vm200_vm1, %v892_v59  ;;  %v879_v0 = vsel %vm55_vm0, %v823_v24, %v863_v61  ;;  %v878_v1 = vsel %vm55_vm0, %v822_v25, %v861_v62 }
 0x432   :  { %v887_v2 = vmul.f32 1.25, %v879_v0  ;;  %v886_v3 = vmul.f32 1.25, %v878_v1 }
 0x434   :  { %v895_v4 = vsel %vm839_vm12, %v887_v2, 0.0  ;;  %v894_v5 = vsel %vm838_vm13, %v886_v3, 0.0 }
 0x435   :  { %903 = vst.msk [vmem:[%s1553_s13 + $0x38] sm:$0xff] %vm200_vm1, %v895_v4  ;;  %902 = vst.msk [vmem:[%s1553_s13 + $0x30] sm:$0xff] %vm200_vm1, %v894_v5 }

</bundles_post_ra>
